<compile_context>
chip_gen: v7x
topology: tpu7x:2x2x1
jax: 0.10.0
libtpu: 0.0.40
codegen_flags: <defaults>
</compile_context>

<pallas_src>
import jax
import jax.numpy as jnp
from jax.experimental import pallas as pl
from jax.experimental.pallas import tpu as pltpu

_LANE = 128
# Bytes per (block_rows, 128) buffer. 2 input bufs + 2 output bufs = 4x this.
_TARGET_TILE_BYTES = 4 * 1024 * 1024
# Below this total size a single block is fine (per-step overhead irrelevant);
# above it we force >= 2 blocks so v7x's two TensorCores both get work.
_MIN_SPLIT_BYTES = 1 * 1024 * 1024
# Row-count granularity: a multiple of 512 keeps the block sublane packing
# legal for every dtype width (8 rows/tile f32, 16 bf16/fp16, 32 int8/fp8).
_ROW_ALIGN = 512
# Scoped-VMEM request: safe on v5e (128 MiB phys), v6e (128), v7x (64).
_VMEM_LIMIT_BYTES = 32 * 1024 * 1024


def _sigmoid_kernel(x_ref, o_ref):
    o_ref[...] = jax.nn.sigmoid(x_ref[...])


def _round_up(v: int, m: int) -> int:
    return (v + m - 1) // m * m


def sigmoid_pallas(x: jax.Array, *, donate: bool = False) -> jax.Array:
    """Elementwise sigmoid over an arbitrary-shaped array via a Pallas kernel."""
    orig_shape = x.shape
    dtype = x.dtype
    n = x.size
    if n == 0:
        return x
    itemsize = jnp.dtype(dtype).itemsize

    rows = pl.cdiv(n, _LANE)
    padded_n = rows * _LANE
    needs_pad = padded_n != n

    flat = x.reshape(-1)
    if needs_pad:
        # TODO(synk): fold the <128-element ragged tail into the kernel with a
        # masked store (scalar-prefetched `n` + pl.when on the last block)
        # instead of this wrapper-side pad + trailing slice.
        flat = jnp.pad(flat, (0, padded_n - n))
    x2d = flat.reshape(rows, _LANE)

    row_bytes = _LANE * itemsize
    total_bytes = rows * row_bytes

    if total_bytes <= _MIN_SPLIT_BYTES:
        # Tiny input: single block equal to the full array (so the (8,128)
        # block-shape rule is satisfied regardless of row count).
        block_rows = rows
        grid = (1,)
        semantics = ("arbitrary",)
    else:
        tile_rows = max(
            _ROW_ALIGN,
            (_TARGET_TILE_BYTES // row_bytes) // _ROW_ALIGN * _ROW_ALIGN,
        )
        # At least two blocks so the "parallel" axis lands one block per
        # TensorCore on v7x; last block may be partial (Pallas masks writeback).
        block_rows = min(tile_rows, _round_up(pl.cdiv(rows, 2), _ROW_ALIGN))
        grid = (pl.cdiv(rows, block_rows),)
        semantics = ("parallel",)

    cost = pl.CostEstimate(
        flops=4 * padded_n,
        transcendentals=padded_n,
        bytes_accessed=2 * padded_n * itemsize,
    )

    out2d = pl.pallas_call(
        _sigmoid_kernel,
        out_shape=jax.ShapeDtypeStruct((rows, _LANE), dtype),
        grid_spec=pltpu.PrefetchScalarGridSpec(
            num_scalar_prefetch=0,
            grid=grid,
            in_specs=[pl.BlockSpec((block_rows, _LANE), lambda i: (i, 0))],
            out_specs=pl.BlockSpec((block_rows, _LANE), lambda i: (i, 0)),
        ),
        compiler_params=pltpu.CompilerParams(
            dimension_semantics=semantics,
            vmem_limit_bytes=_VMEM_LIMIT_BYTES,
        ),
        cost_estimate=cost,
        input_output_aliases={0: 0} if donate else {},
    )(x2d)

    if needs_pad:
        return out2d.reshape(-1)[:n].reshape(orig_shape)
    return out2d.reshape(orig_shape)


if __name__ == "__main__":
    key = jax.random.PRNGKey(0)
    k0, k1, k2, k3, k4 = jax.random.split(key, 5)

    # Small NCHW input consistent with the module's forward (Sigmoid only).
    x = jax.random.normal(k0, (2, 4, 16, 16), dtype=jnp.float32)
    y = sigmoid_pallas(x)
    jax.block_until_ready(y)
    assert y.shape == x.shape and y.dtype == x.dtype
    assert jnp.allclose(y, jax.nn.sigmoid(x), atol=1e-6)

    # Tiled multi-block path: 4096 rows (2 MiB) -> >=2 "parallel" grid blocks.
    x_big = jax.random.normal(k1, (4, 8, 128, 128), dtype=jnp.float32)
    y_big = sigmoid_pallas(x_big)
    jax.block_until_ready(y_big)
    assert jnp.allclose(y_big, jax.nn.sigmoid(x_big), atol=1e-6)

    # n % 128 == 0 but row count not a multiple of 8: no padding needed now.
    x_odd = jax.random.normal(k2, (2, 5, 128), dtype=jnp.float32)  # 10 rows
    y_odd = sigmoid_pallas(x_odd)
    jax.block_until_ready(y_odd)
    assert jnp.allclose(y_odd, jax.nn.sigmoid(x_odd), atol=1e-6)

    # Ragged fallback path (element count not a multiple of 128).
    x_rag = jax.random.normal(k3, (2, 3, 7, 5), dtype=jnp.float32)
    y_rag = sigmoid_pallas(x_rag)
    jax.block_until_ready(y_rag)
    assert jnp.allclose(y_rag, jax.nn.sigmoid(x_rag), atol=1e-6)

    # bf16 coverage (sublane packing of sub-32-bit dtypes).
    x_bf = jax.random.normal(k4, (2, 4, 16, 16), dtype=jnp.bfloat16)
    y_bf = sigmoid_pallas(x_bf)
    jax.block_until_ready(y_bf)
    assert y_bf.dtype == jnp.bfloat16
    assert jnp.allclose(
        y_bf.astype(jnp.float32),
        jax.nn.sigmoid(x_bf).astype(jnp.float32),
        atol=1e-2,
    )

    print("KERNEL_OK")
</pallas_src>

<mosaic_0001>
module attributes {stable_mosaic.version = 11 : i64} {
  func.func @_sigmoid_kernel(%arg0: i32, %arg1: memref<16x128xf32, #tpu.memory_space<vmem>>, %arg2: memref<16x128xf32, #tpu.memory_space<vmem>>) attributes {dimension_semantics = [#tpu.dimension_semantics<arbitrary>], iteration_bounds = array<i64: 1>, scalar_prefetch = 0 : i64, scratch_operands = 0 : i64, tpu.core_type = #tpu.core_type<tc>, window_params = [{transform_indices = @transform_0, window_bounds = array<i64: 16, 128>}, {transform_indices = @transform_1, window_bounds = array<i64: 16, 128>}]} {
    %c0 = arith.constant 0 : index
    %c0_0 = arith.constant 0 : index
    %0 = vector.load %arg1[%c0, %c0_0] : memref<16x128xf32, #tpu.memory_space<vmem>>, vector<16x128xf32>
    %1 = arith.negf %0 : vector<16x128xf32>
    %2 = math.exp %1 : vector<16x128xf32>
    %cst = arith.constant 1.000000e+00 : f32
    %3 = vector.broadcast %cst : f32 to vector<16x128xf32>
    %4 = arith.addf %3, %2 : vector<16x128xf32>
    %5 = arith.divf %3, %4 : vector<16x128xf32>
    %c0_1 = arith.constant 0 : index
    %c0_2 = arith.constant 0 : index
    %6 = vector.load %arg2[%c0_1, %c0_2] : memref<16x128xf32, #tpu.memory_space<vmem>>, vector<16x128xf32>
    tpu.vector_store %arg2[%c0_1, %c0_2], %5 {strides = array<i32>} : memref<16x128xf32, #tpu.memory_space<vmem>>, vector<16x128xf32>,
    return
  }
  func.func @transform_0(%arg0: i32) -> (i32, i32) {
    %c0_i32 = arith.constant 0 : i32
    %c0_i32_0 = arith.constant 0 : i32
    return %arg0, %c0_i32 : i32, i32
  }
  func.func @transform_1(%arg0: i32) -> (i32, i32) {
    %c0_i32 = arith.constant 0 : i32
    %c0_i32_0 = arith.constant 0 : i32
    return %arg0, %c0_i32 : i32, i32
  }
}

</mosaic_0001>

<bundles_post_ra>
// kernel: tpu_custom_call.1
= control target key start
LH: loop header
LB: loop body
LE: loop exit
PB: predicated region body
PF: predicated region fallthrough
CT: control target
= control target key end

     0   :  { %6 = vsyncpa [#allocation3], 0  ;;  %s162_s0 = inlined_call_operand.hbm [shape: f32[16,128], index: 0, kind: input, shape index: {}]   ;;  %s163_s1 = inlined_call_operand.hbm [shape: f32[16,128], index: 1, kind: output, shape index: {}]  }
   0x1   :  { %7 = vsyncpa [#allocation4], 0  ;;  %s118_s6 = smov [#allocation2]   ;;  %s70_s10 = scalar_lea.hbm %s162_s0, 256 }
   0x2   :  { %s13_s7 = sshll.u32 %s118_s6, 4  ;;  %p71_p0 = scmp.ne.s32.totalorder %s162_s0, %s70_s10  ;;  %s14_s7 = int_to_ptr.vmem [resolvable:$true] %s13_s7 }
   0x3   :  { %p74_p1 = scmp.lt.u32.totalorder %s70_s10, %s162_s0 }
   0x5   :  { %p76_p2 = pnand %p74_p1, %p71_p0 }
   0x7   :  { %79 = shalt.err (!%p76_p2)
}
   0x8   :  { %s80_s15 = scalar_lea.vmem %s14_s7, 256  ;;  %p85_p4 = scmp.lt.s32.totalorder %s14_s7, %s14_s7 }
   0x9   :  { %p81_p3 = scmp.ne.s32.totalorder %s14_s7, %s80_s15  ;;  %p86_p5 = scmp.lt.s32.totalorder %s80_s15, %s80_s15 }
   0xb   :  { %p87_p6 = por %p86_p5, %p85_p4 }
   0xd   :  { %p88_p7 = pnand %p87_p6, %p81_p3 }
   0xf   :  { %91 = shalt.err (!%p88_p7)
}
  0x10   :  { %s119_s16 = smov 128   ;;  %s120_s17 = smov 8  }
  0x11   :  { %19 = dma.hbm_to_vmem [thread:$0]  %s162_s0, 256, %s14_s7, [#allocation3], %s119_s16, %s119_s16, %s120_s17  }
  0x12   :  { %114 = dma.done.wait [#allocation3], 256  }
  0x13   :  { %115 = vsyncadd [#allocation3], 4294967040  ;;  %v23_v0 = vld [vmem:[#allocation2] sm:$0xff]  ;;  %v24_v1 = vld [vmem:[#allocation2 + $0x8] sm:$0xff]  ;;  %s121_s20 = smov [#allocation5]  }
  0x14   :  { %v56_v2 = vmul.f32 -1.442695, %v23_v0  ;;  %v57_v3 = vmul.f32 -1.442695, %v24_v1  ;;  %s44_s21 = sshll.u32 %s121_s20, 4  ;;  %s45_s21 = int_to_ptr.vmem [resolvable:$true] %s44_s21 }
  0x15   :  { %s92_s0 = scalar_lea.vmem %s45_s21, 256  ;;  %p97_p9 = scmp.lt.s32.totalorder %s45_s21, %s45_s21 }
  0x16   :  { %62 = vpow2.f32 %v56_v2  ;;  %p93_p8 = scmp.ne.s32.totalorder %s45_s21, %s92_s0  ;;  %p98_p10 = scmp.lt.s32.totalorder %s92_s0, %s92_s0 }
  0x17   :  { %64 = vpow2.f32 %v57_v3 }
  0x18   :  { %p99_p11 = por %p98_p10, %p97_p9 }
  0x1a   :  { %p100_p12 = pnand %p99_p11, %p93_p8 }
  0x20   :  { %v63_v4 = vpop.eup %62 }
  0x21   :  { %v65_v5 = vpop.eup %64  ;;  %v31_v6 = vadd.f32 1.0, %v63_v4 }
  0x22   :  { %v32_v7 = vadd.f32 1.0, %v65_v5 }
  0x23   :  { %66 = vrcp.f32 %v31_v6 }
  0x24   :  { %68 = vrcp.f32 %v32_v7 }
  0x2d   :  { %v67_v8 = vpop.eup %66 }
  0x2e   :  { %v69_v9 = vpop.eup %68  ;;  %37 = vst [vmem:[#allocation5] sm:$0xff] %v67_v8 }
  0x2f   :  { %38 = vst [vmem:[#allocation5 + $0x8] sm:$0xff] %v69_v9 }
  0x30   :  { %103 = shalt.err (!%p100_p12)
}
  0x31   :  { %s104_s24 = scalar_lea.hbm %s163_s1, 256 }
  0x32   :  { %p105_p13 = scmp.ne.s32.totalorder %s163_s1, %s104_s24  ;;  %p108_p0 = scmp.lt.u32.totalorder %s104_s24, %s163_s1 }
  0x34   :  { %p110_p1 = pnand %p108_p0, %p105_p13 }
  0x36   :  { %113 = shalt.err (!%p110_p1)
}
  0x37   :  { %50 = dma.vmem_to_hbm [thread:$0]  %s45_s21, 256, %s163_s1, [#allocation4], %s119_s16, %s119_s16, %s120_s17  }
  0x38   :  { %116 = dma.done.wait [#allocation4], 256  }
  0x39   :  { %117 = vsyncadd [#allocation4], 4294967040 }
  0x3a   :  { %54 = vsyncpa [#allocation3], 1 }
  0x3b   :  { %55 = vsyncpa [#allocation4], 1 }

</bundles_post_ra>
